<compile_context>
chip_gen: v7x
topology: tpu7x:2x2x1
jax: 0.10.0
libtpu: 0.0.40
codegen_flags: <defaults>
</compile_context>

<pallas_src>
import functools
import math

import jax
import jax.numpy as jnp
from jax.experimental import pallas as pl
from jax.experimental.pallas import tpu as pltpu


# --------------------------------------------------------------------------
# Fused Pallas kernel: one (batch) tile per grid step.
# --------------------------------------------------------------------------
def _fused_mha_kernel(q_ref, k_ref, v_ref, wk_ref, bk_ref, wo_ref, bo_ref,
                      o_ref, *, heads, scale):
    S, D = q_ref.shape
    d_k = D // heads

    # --- shared projection: k_linear applied to q, k and v (module quirk).
    # One [3S, D] @ [D, D] MXU matmul instead of three separate launches.
    x = jnp.concatenate([q_ref[...], k_ref[...], v_ref[...]], axis=0)
    proj = jnp.dot(x, wk_ref[...], preferred_element_type=jnp.float32)
    proj = proj + bk_ref[...]
    qp = proj[0:S] * scale           # fold 1/sqrt(d_k) into q once
    kp = proj[S:2 * S]
    vp = proj[2 * S:3 * S]

    # --- attention: heads statically unrolled inside the per-batch block.
    head_outs = []
    for h in range(heads):
        cols = slice(h * d_k, (h + 1) * d_k)
        qh = qp[:, cols]             # [S, d_k]
        kh = kp[:, cols]
        vh = vp[:, cols]

        # scores = q @ k^T (contract last axes; no explicit transpose of k)
        s = jax.lax.dot_general(qh, kh, (((1,), (1,)), ((), ())),
                                preferred_element_type=jnp.float32)   # [S, S]

        # numerically-stable softmax over the last axis
        s = s - jnp.max(s, axis=-1, keepdims=True)
        p = jnp.exp(s)
        p = p * pl.reciprocal(jnp.sum(p, axis=-1, keepdims=True), approx=True)

        head_outs.append(jnp.dot(p, vh, preferred_element_type=jnp.float32))

    # lane-dense concat layout [S, D] produced directly inside the kernel
    concat = jnp.concatenate(head_outs, axis=-1)

    # --- output projection fused in the same kernel
    out = jnp.dot(concat, wo_ref[...], preferred_element_type=jnp.float32)
    out = out + bo_ref[...]
    o_ref[...] = out.astype(o_ref.dtype)


def multi_head_attention_forward(params, q, k, v, heads):
    """q, k, v: [B, S, D] -> [B, S, D].  Matches the PyTorch forward (mask=None)."""
    B, S, D = q.shape
    d_k = D // heads
    wk, bk = params["k_linear"]      # module uses k_linear for all three projections
    wo, bo = params["out"]

    act_spec = pl.BlockSpec((pl.Squeezed(), S, D), lambda b: (b, 0, 0))
    w_spec = pl.BlockSpec((D, D), lambda b: (0, 0))
    b_spec = pl.BlockSpec((1, D), lambda b: (0, 0))

    kernel = functools.partial(_fused_mha_kernel, heads=heads,
                               scale=1.0 / math.sqrt(d_k))

    return pl.pallas_call(
        kernel,
        out_shape=jax.ShapeDtypeStruct((B, S, D), q.dtype),
        grid=(B,),
        in_specs=[act_spec, act_spec, act_spec, w_spec, b_spec, w_spec, b_spec],
        out_specs=act_spec,
        compiler_params=pltpu.CompilerParams(
            dimension_semantics=("parallel",),
        ),
    )(q, k, v, wk, bk.reshape(1, D), wo, bo.reshape(1, D))


# --------------------------------------------------------------------------
# Parameter init (mirrors nn.Linear's U(-1/sqrt(fan_in), 1/sqrt(fan_in)))
# --------------------------------------------------------------------------
def init_mha_params(key, d_model):
    bound = 1.0 / math.sqrt(d_model)
    keys = jax.random.split(key, 8)

    def lin(kw, kb):
        w = jax.random.uniform(kw, (d_model, d_model), jnp.float32, -bound, bound)
        b = jax.random.uniform(kb, (d_model,), jnp.float32, -bound, bound)
        return w, b

    return {
        "q_linear": lin(keys[0], keys[1]),   # unused in forward (module quirk)
        "k_linear": lin(keys[2], keys[3]),
        "v_linear": lin(keys[4], keys[5]),   # unused in forward (module quirk)
        "out": lin(keys[6], keys[7]),
    }


# --------------------------------------------------------------------------
# Pure-JAX reference (for correctness checking)
# --------------------------------------------------------------------------
def reference_forward(params, q, k, v, heads):
    B, Sq, D = q.shape
    d_k = D // heads
    wk, bk = params["k_linear"]
    wo, bo = params["out"]

    def project(x):
        Bx, Sx, _ = x.shape
        y = x.reshape(Bx * Sx, D) @ wk + bk
        return y.reshape(Bx, Sx, heads, d_k).transpose(0, 2, 1, 3)

    qh, kh, vh = project(q), project(k), project(v)
    scores = jnp.einsum("bhqd,bhkd->bhqk", qh, kh) / math.sqrt(d_k)
    p = jax.nn.softmax(scores, axis=-1)
    o = jnp.einsum("bhqk,bhkd->bhqd", p, vh)
    concat = o.transpose(0, 2, 1, 3).reshape(B, Sq, D)
    return (concat.reshape(B * Sq, D) @ wo + bo).reshape(B, Sq, D)


# --------------------------------------------------------------------------
if __name__ == "__main__":
    B, S, D, HEADS = 2, 8, 32, 4

    key = jax.random.PRNGKey(0)
    kp, kq, kk, kv = jax.random.split(key, 4)

    params = init_mha_params(kp, D)
    q = jax.random.normal(kq, (B, S, D), jnp.float32)
    k = jax.random.normal(kk, (B, S, D), jnp.float32)
    v = jax.random.normal(kv, (B, S, D), jnp.float32)

    out = multi_head_attention_forward(params, q, k, v, HEADS)
    out = jax.block_until_ready(out)

    ref = reference_forward(params, q, k, v, HEADS)
    assert out.shape == (B, S, D)
    # tolerance loosened slightly vs the bit-exact path because of
    # pl.reciprocal(approx=True) in the softmax denominator
    assert jnp.allclose(out, ref, atol=2e-2, rtol=2e-2), "mismatch vs reference"

    print("KERNEL_OK")
</pallas_src>

<mosaic_0001>
module attributes {stable_mosaic.version = 11 : i64} {
  func.func @_fused_mha_kernel(%arg0: i32, %arg1: memref<1x8x32xf32, #tpu.memory_space<vmem>>, %arg2: memref<1x8x32xf32, #tpu.memory_space<vmem>>, %arg3: memref<1x8x32xf32, #tpu.memory_space<vmem>>, %arg4: memref<32x32xf32, #tpu.memory_space<vmem>>, %arg5: memref<1x32xf32, #tpu.memory_space<vmem>>, %arg6: memref<32x32xf32, #tpu.memory_space<vmem>>, %arg7: memref<1x32xf32, #tpu.memory_space<vmem>>, %arg8: memref<1x8x32xf32, #tpu.memory_space<vmem>>) attributes {dimension_semantics = [#tpu.dimension_semantics<parallel>], iteration_bounds = array<i64: 2>, scalar_prefetch = 0 : i64, scratch_operands = 0 : i64, tpu.core_type = #tpu.core_type<tc>, window_params = [{transform_indices = @transform_0, window_bounds = array<i64: 1, 8, 32>}, {transform_indices = @transform_1, window_bounds = array<i64: 1, 8, 32>}, {transform_indices = @transform_2, window_bounds = array<i64: 1, 8, 32>}, {pipeline_mode = #tpu.pipeline_mode<synchronous>, transform_indices = @transform_3, window_bounds = array<i64: 32, 32>}, {pipeline_mode = #tpu.pipeline_mode<synchronous>, transform_indices = @transform_4, window_bounds = array<i64: 1, 32>}, {pipeline_mode = #tpu.pipeline_mode<synchronous>, transform_indices = @transform_5, window_bounds = array<i64: 32, 32>}, {pipeline_mode = #tpu.pipeline_mode<synchronous>, transform_indices = @transform_6, window_bounds = array<i64: 1, 32>}, {transform_indices = @transform_7, window_bounds = array<i64: 1, 8, 32>}]} {
    %c0 = arith.constant 0 : index
    %c0_0 = arith.constant 0 : index
    %c0_1 = arith.constant 0 : index
    %0 = vector.load %arg1[%c0, %c0_0, %c0_1] : memref<1x8x32xf32, #tpu.memory_space<vmem>>, vector<1x8x32xf32>
    %1 = vector.shape_cast %0 : vector<1x8x32xf32> to vector<8x32xf32>
    %c0_2 = arith.constant 0 : index
    %c0_3 = arith.constant 0 : index
    %c0_4 = arith.constant 0 : index
    %2 = vector.load %arg2[%c0_2, %c0_3, %c0_4] : memref<1x8x32xf32, #tpu.memory_space<vmem>>, vector<1x8x32xf32>
    %3 = vector.shape_cast %2 : vector<1x8x32xf32> to vector<8x32xf32>
    %c0_5 = arith.constant 0 : index
    %c0_6 = arith.constant 0 : index
    %c0_7 = arith.constant 0 : index
    %4 = vector.load %arg3[%c0_5, %c0_6, %c0_7] : memref<1x8x32xf32, #tpu.memory_space<vmem>>, vector<1x8x32xf32>
    %5 = vector.shape_cast %4 : vector<1x8x32xf32> to vector<8x32xf32>
    %6 = tpu.concatenate %1, %3, %5 in 0 : vector<8x32xf32>, vector<8x32xf32>, vector<8x32xf32> -> vector<24x32xf32>
    %c0_8 = arith.constant 0 : index
    %c0_9 = arith.constant 0 : index
    %7 = vector.load %arg4[%c0_8, %c0_9] : memref<32x32xf32, #tpu.memory_space<vmem>>, vector<32x32xf32>
    %cst = arith.constant dense<0.000000e+00> : vector<24x32xf32>
    %8 = tpu.matmul %6, %7, %cst {dimension_numbers = #tpu.dot_dimension_numbers<[1], [0], [0], [1], [0, 0, 1, 1], [], []>} : vector<24x32xf32>, vector<32x32xf32>, vector<24x32xf32> -> vector<24x32xf32>
    %c0_10 = arith.constant 0 : index
    %c0_11 = arith.constant 0 : index
    %9 = vector.load %arg5[%c0_10, %c0_11] : memref<1x32xf32, #tpu.memory_space<vmem>>, vector<1x32xf32>
    %10 = vector.broadcast %9 : vector<1x32xf32> to vector<24x32xf32>
    %11 = arith.addf %8, %10 : vector<24x32xf32>
    %12 = vector.extract_strided_slice %11 {offsets = [0, 0], sizes = [8, 32], strides = [1, 1]} : vector<24x32xf32> to vector<8x32xf32>
    %cst_12 = arith.constant 0.353553385 : f32
    %13 = vector.broadcast %cst_12 : f32 to vector<8x32xf32>
    %14 = arith.mulf %12, %13 : vector<8x32xf32>
    %15 = vector.extract_strided_slice %11 {offsets = [8, 0], sizes = [8, 32], strides = [1, 1]} : vector<24x32xf32> to vector<8x32xf32>
    %16 = vector.extract_strided_slice %11 {offsets = [16, 0], sizes = [8, 32], strides = [1, 1]} : vector<24x32xf32> to vector<8x32xf32>
    %17 = vector.extract_strided_slice %14 {offsets = [0, 0], sizes = [8, 8], strides = [1, 1]} : vector<8x32xf32> to vector<8x8xf32>
    %18 = vector.extract_strided_slice %15 {offsets = [0, 0], sizes = [8, 8], strides = [1, 1]} : vector<8x32xf32> to vector<8x8xf32>
    %19 = vector.extract_strided_slice %16 {offsets = [0, 0], sizes = [8, 8], strides = [1, 1]} : vector<8x32xf32> to vector<8x8xf32>
    %cst_13 = arith.constant dense<0.000000e+00> : vector<8x8xf32>
    %20 = tpu.matmul %17, %18, %cst_13 {dimension_numbers = #tpu.dot_dimension_numbers<[1], [1], [0], [0], [0, 0, 1, 0], [], []>} : vector<8x8xf32>, vector<8x8xf32>, vector<8x8xf32> -> vector<8x8xf32>
    %cst_14 = arith.constant dense<0xFF800000> : vector<8xf32>
    %21 = vector.multi_reduction <maximumf>, %20, %cst_14 [1] : vector<8x8xf32> to vector<8xf32>
    %22 = vector.shape_cast %21 : vector<8xf32> to vector<8x1xf32>
    %23 = vector.broadcast %22 : vector<8x1xf32> to vector<8x8xf32>
    %24 = arith.subf %20, %23 : vector<8x8xf32>
    %25 = math.exp %24 : vector<8x8xf32>
    %cst_15 = arith.constant dense<0.000000e+00> : vector<8xf32>
    %26 = vector.multi_reduction <add>, %25, %cst_15 [1] : vector<8x8xf32> to vector<8xf32>
    %27 = vector.shape_cast %26 : vector<8xf32> to vector<8x1xf32>
    %28 = tpu.reciprocal %27 {approx = true} : vector<8x1xf32> -> vector<8x1xf32>
    %29 = vector.broadcast %28 : vector<8x1xf32> to vector<8x8xf32>
    %30 = arith.mulf %25, %29 : vector<8x8xf32>
    %cst_16 = arith.constant dense<0.000000e+00> : vector<8x8xf32>
    %31 = tpu.matmul %30, %19, %cst_16 {dimension_numbers = #tpu.dot_dimension_numbers<[1], [0], [0], [1], [0, 0, 1, 1], [], []>} : vector<8x8xf32>, vector<8x8xf32>, vector<8x8xf32> -> vector<8x8xf32>
    %32 = vector.extract_strided_slice %14 {offsets = [0, 8], sizes = [8, 8], strides = [1, 1]} : vector<8x32xf32> to vector<8x8xf32>
    %33 = vector.extract_strided_slice %15 {offsets = [0, 8], sizes = [8, 8], strides = [1, 1]} : vector<8x32xf32> to vector<8x8xf32>
    %34 = vector.extract_strided_slice %16 {offsets = [0, 8], sizes = [8, 8], strides = [1, 1]} : vector<8x32xf32> to vector<8x8xf32>
    %cst_17 = arith.constant dense<0.000000e+00> : vector<8x8xf32>
    %35 = tpu.matmul %32, %33, %cst_17 {dimension_numbers = #tpu.dot_dimension_numbers<[1], [1], [0], [0], [0, 0, 1, 0], [], []>} : vector<8x8xf32>, vector<8x8xf32>, vector<8x8xf32> -> vector<8x8xf32>
    %cst_18 = arith.constant dense<0xFF800000> : vector<8xf32>
    %36 = vector.multi_reduction <maximumf>, %35, %cst_18 [1] : vector<8x8xf32> to vector<8xf32>
    %37 = vector.shape_cast %36 : vector<8xf32> to vector<8x1xf32>
    %38 = vector.broadcast %37 : vector<8x1xf32> to vector<8x8xf32>
    %39 = arith.subf %35, %38 : vector<8x8xf32>
    %40 = math.exp %39 : vector<8x8xf32>
    %cst_19 = arith.constant dense<0.000000e+00> : vector<8xf32>
    %41 = vector.multi_reduction <add>, %40, %cst_19 [1] : vector<8x8xf32> to vector<8xf32>
    %42 = vector.shape_cast %41 : vector<8xf32> to vector<8x1xf32>
    %43 = tpu.reciprocal %42 {approx = true} : vector<8x1xf32> -> vector<8x1xf32>
    %44 = vector.broadcast %43 : vector<8x1xf32> to vector<8x8xf32>
    %45 = arith.mulf %40, %44 : vector<8x8xf32>
    %cst_20 = arith.constant dense<0.000000e+00> : vector<8x8xf32>
    %46 = tpu.matmul %45, %34, %cst_20 {dimension_numbers = #tpu.dot_dimension_numbers<[1], [0], [0], [1], [0, 0, 1, 1], [], []>} : vector<8x8xf32>, vector<8x8xf32>, vector<8x8xf32> -> vector<8x8xf32>
    %47 = vector.extract_strided_slice %14 {offsets = [0, 16], sizes = [8, 8], strides = [1, 1]} : vector<8x32xf32> to vector<8x8xf32>
    %48 = vector.extract_strided_slice %15 {offsets = [0, 16], sizes = [8, 8], strides = [1, 1]} : vector<8x32xf32> to vector<8x8xf32>
    %49 = vector.extract_strided_slice %16 {offsets = [0, 16], sizes = [8, 8], strides = [1, 1]} : vector<8x32xf32> to vector<8x8xf32>
    %cst_21 = arith.constant dense<0.000000e+00> : vector<8x8xf32>
    %50 = tpu.matmul %47, %48, %cst_21 {dimension_numbers = #tpu.dot_dimension_numbers<[1], [1], [0], [0], [0, 0, 1, 0], [], []>} : vector<8x8xf32>, vector<8x8xf32>, vector<8x8xf32> -> vector<8x8xf32>
    %cst_22 = arith.constant dense<0xFF800000> : vector<8xf32>
    %51 = vector.multi_reduction <maximumf>, %50, %cst_22 [1] : vector<8x8xf32> to vector<8xf32>
    %52 = vector.shape_cast %51 : vector<8xf32> to vector<8x1xf32>
    %53 = vector.broadcast %52 : vector<8x1xf32> to vector<8x8xf32>
    %54 = arith.subf %50, %53 : vector<8x8xf32>
    %55 = math.exp %54 : vector<8x8xf32>
    %cst_23 = arith.constant dense<0.000000e+00> : vector<8xf32>
    %56 = vector.multi_reduction <add>, %55, %cst_23 [1] : vector<8x8xf32> to vector<8xf32>
    %57 = vector.shape_cast %56 : vector<8xf32> to vector<8x1xf32>
    %58 = tpu.reciprocal %57 {approx = true} : vector<8x1xf32> -> vector<8x1xf32>
    %59 = vector.broadcast %58 : vector<8x1xf32> to vector<8x8xf32>
    %60 = arith.mulf %55, %59 : vector<8x8xf32>
    %cst_24 = arith.constant dense<0.000000e+00> : vector<8x8xf32>
    %61 = tpu.matmul %60, %49, %cst_24 {dimension_numbers = #tpu.dot_dimension_numbers<[1], [0], [0], [1], [0, 0, 1, 1], [], []>} : vector<8x8xf32>, vector<8x8xf32>, vector<8x8xf32> -> vector<8x8xf32>
    %62 = vector.extract_strided_slice %14 {offsets = [0, 24], sizes = [8, 8], strides = [1, 1]} : vector<8x32xf32> to vector<8x8xf32>
    %63 = vector.extract_strided_slice %15 {offsets = [0, 24], sizes = [8, 8], strides = [1, 1]} : vector<8x32xf32> to vector<8x8xf32>
    %64 = vector.extract_strided_slice %16 {offsets = [0, 24], sizes = [8, 8], strides = [1, 1]} : vector<8x32xf32> to vector<8x8xf32>
    %cst_25 = arith.constant dense<0.000000e+00> : vector<8x8xf32>
    %65 = tpu.matmul %62, %63, %cst_25 {dimension_numbers = #tpu.dot_dimension_numbers<[1], [1], [0], [0], [0, 0, 1, 0], [], []>} : vector<8x8xf32>, vector<8x8xf32>, vector<8x8xf32> -> vector<8x8xf32>
    %cst_26 = arith.constant dense<0xFF800000> : vector<8xf32>
    %66 = vector.multi_reduction <maximumf>, %65, %cst_26 [1] : vector<8x8xf32> to vector<8xf32>
    %67 = vector.shape_cast %66 : vector<8xf32> to vector<8x1xf32>
    %68 = vector.broadcast %67 : vector<8x1xf32> to vector<8x8xf32>
    %69 = arith.subf %65, %68 : vector<8x8xf32>
    %70 = math.exp %69 : vector<8x8xf32>
    %cst_27 = arith.constant dense<0.000000e+00> : vector<8xf32>
    %71 = vector.multi_reduction <add>, %70, %cst_27 [1] : vector<8x8xf32> to vector<8xf32>
    %72 = vector.shape_cast %71 : vector<8xf32> to vector<8x1xf32>
    %73 = tpu.reciprocal %72 {approx = true} : vector<8x1xf32> -> vector<8x1xf32>
    %74 = vector.broadcast %73 : vector<8x1xf32> to vector<8x8xf32>
    %75 = arith.mulf %70, %74 : vector<8x8xf32>
    %cst_28 = arith.constant dense<0.000000e+00> : vector<8x8xf32>
    %76 = tpu.matmul %75, %64, %cst_28 {dimension_numbers = #tpu.dot_dimension_numbers<[1], [0], [0], [1], [0, 0, 1, 1], [], []>} : vector<8x8xf32>, vector<8x8xf32>, vector<8x8xf32> -> vector<8x8xf32>
    %77 = tpu.concatenate %31, %46, %61, %76 in 1 : vector<8x8xf32>, vector<8x8xf32>, vector<8x8xf32>, vector<8x8xf32> -> vector<8x32xf32>
    %c0_29 = arith.constant 0 : index
    %c0_30 = arith.constant 0 : index
    %78 = vector.load %arg6[%c0_29, %c0_30] : memref<32x32xf32, #tpu.memory_space<vmem>>, vector<32x32xf32>
    %cst_31 = arith.constant dense<0.000000e+00> : vector<8x32xf32>
    %79 = tpu.matmul %77, %78, %cst_31 {dimension_numbers = #tpu.dot_dimension_numbers<[1], [0], [0], [1], [0, 0, 1, 1], [], []>} : vector<8x32xf32>, vector<32x32xf32>, vector<8x32xf32> -> vector<8x32xf32>
    %c0_32 = arith.constant 0 : index
    %c0_33 = arith.constant 0 : index
    %80 = vector.load %arg7[%c0_32, %c0_33] : memref<1x32xf32, #tpu.memory_space<vmem>>, vector<1x32xf32>
    %81 = vector.broadcast %80 : vector<1x32xf32> to vector<8x32xf32>
    %82 = arith.addf %79, %81 : vector<8x32xf32>
    %c0_34 = arith.constant 0 : index
    %c0_35 = arith.constant 0 : index
    %c0_36 = arith.constant 0 : index
    %83 = vector.load %arg8[%c0_34, %c0_35, %c0_36] : memref<1x8x32xf32, #tpu.memory_space<vmem>>, vector<1x8x32xf32>
    %84 = vector.shape_cast %83 : vector<1x8x32xf32> to vector<8x32xf32>
    %85 = vector.shape_cast %82 : vector<8x32xf32> to vector<1x8x32xf32>
    tpu.vector_store %arg8[%c0_34, %c0_35, %c0_36], %85 {strides = array<i32>} : memref<1x8x32xf32, #tpu.memory_space<vmem>>, vector<1x8x32xf32>,
    return
  }
  func.func @transform_0(%arg0: i32) -> (i32, i32, i32) {
    %c0_i32 = arith.constant 0 : i32
    %c0_i32_0 = arith.constant 0 : i32
    %c0_i32_1 = arith.constant 0 : i32
    return %arg0, %c0_i32, %c0_i32_0 : i32, i32, i32
  }
  func.func @transform_1(%arg0: i32) -> (i32, i32, i32) {
    %c0_i32 = arith.constant 0 : i32
    %c0_i32_0 = arith.constant 0 : i32
    %c0_i32_1 = arith.constant 0 : i32
    return %arg0, %c0_i32, %c0_i32_0 : i32, i32, i32
  }
  func.func @transform_2(%arg0: i32) -> (i32, i32, i32) {
    %c0_i32 = arith.constant 0 : i32
    %c0_i32_0 = arith.constant 0 : i32
    %c0_i32_1 = arith.constant 0 : i32
    return %arg0, %c0_i32, %c0_i32_0 : i32, i32, i32
  }
  func.func @transform_3(%arg0: i32) -> (i32, i32) {
    %c0_i32 = arith.constant 0 : i32
    %c0_i32_0 = arith.constant 0 : i32
    %c0_i32_1 = arith.constant 0 : i32
    return %c0_i32, %c0_i32_0 : i32, i32
  }
  func.func @transform_4(%arg0: i32) -> (i32, i32) {
    %c0_i32 = arith.constant 0 : i32
    %c0_i32_0 = arith.constant 0 : i32
    %c0_i32_1 = arith.constant 0 : i32
    return %c0_i32, %c0_i32_0 : i32, i32
  }
  func.func @transform_5(%arg0: i32) -> (i32, i32) {
    %c0_i32 = arith.constant 0 : i32
    %c0_i32_0 = arith.constant 0 : i32
    %c0_i32_1 = arith.constant 0 : i32
    return %c0_i32, %c0_i32_0 : i32, i32
  }
  func.func @transform_6(%arg0: i32) -> (i32, i32) {
    %c0_i32 = arith.constant 0 : i32
    %c0_i32_0 = arith.constant 0 : i32
    %c0_i32_1 = arith.constant 0 : i32
    return %c0_i32, %c0_i32_0 : i32, i32
  }
  func.func @transform_7(%arg0: i32) -> (i32, i32, i32) {
    %c0_i32 = arith.constant 0 : i32
    %c0_i32_0 = arith.constant 0 : i32
    %c0_i32_1 = arith.constant 0 : i32
    return %arg0, %c0_i32, %c0_i32_0 : i32, i32, i32
  }
}

</mosaic_0001>

<bundles_post_ra>
// kernel: tpu_custom_call.1
= control target key start
LH: loop header
LB: loop body
LE: loop exit
PB: predicated region body
PF: predicated region fallthrough
CT: control target
= control target key end

     0   :  { %s2327_s0 = inlined_call_operand.hbm [shape: f32[2,8,32], index: 0, kind: input, shape index: {}]   ;;  %s2328_s1 = inlined_call_operand.hbm [shape: f32[2,8,32], index: 1, kind: input, shape index: {}]   ;;  %s2329_s2 = inlined_call_operand.hbm [shape: f32[2,8,32], index: 2, kind: input, shape index: {}]   ;;  %s2330_s3 = inlined_call_operand.hbm [shape: f32[32,32], index: 3, kind: input, shape index: {}]   ;;  %s2331_s4 = inlined_call_operand.vmem [shape: f32[1,32], index: 4, kind: input, shape index: {}]   ;;  %s2332_s5 = inlined_call_operand.hbm [shape: f32[32,32], index: 5, kind: input, shape index: {}]   ;;  %s2333_s6 = inlined_call_operand.vmem [shape: f32[1,32], index: 6, kind: input, shape index: {}]   ;;  %s2334_s7 = inlined_call_operand.hbm [shape: f32[2,8,32], index: 7, kind: output, shape index: {}]  }
   0x1   :  { %2352 = sst [smem:[#allocation19_spill]] %s2328_s1 }
   0x2   :  { %2353 = sst [smem:[#allocation20_spill]] %s2330_s3 }
   0x3   :  { %12 = vsyncpa [#allocation3], 0 }
   0x4   :  { %14 = vsyncpa [#allocation3 + $0x1], 0 }
   0x5   :  { %15 = vsyncpa [#allocation6], 0 }
   0x6   :  { %17 = vsyncpa [#allocation6 + $0x1], 0 }
   0x7   :  { %18 = vsyncpa [#allocation9], 0 }
   0x8   :  { %19 = vsyncpa [#allocation4], 0 }
   0x9   :  { %21 = vsyncpa [#allocation4 + $0x1], 0  ;;  %s1935_s24 = smov 0   ;;  %s1937_s25 = smov 0  }
   0xa   :  { %s1939_s26 = smov 0   ;;  %s1941_s27 = smov 0  }
   0xb LB: > { %2354 = sst [smem:[#allocation16_spill]] %s1876_s27  ;;  %s1956_s28 = sadd.s32 4294967295, %s1876_s27   ;;  %s1876_s27 = sphi %s1941_s27, %s2384_s27   ;;  %s1872_s26 = sphi %s1939_s26, %s2388_s26   ;;  %s1868_s25 = sphi %s1937_s25, %s2387_s25   ;;  %s1864_s24 = sphi %s1935_s24, %s2386_s24  }
   0xc   : > { %s1404_s29 = sadd.s32 4294967294, %s1876_s27   ;;  %p47_p0 = scmp.ne.s32.totalorder %s1868_s25, %s1864_s24 }
   0xd   : > { %p2335_p1 = scmp.eq.s32.totalorder %s1956_s28, 0  ;;  %p213_p3 = scmp.eq.s32.totalorder %s1404_s29, 1 }
   0xe   : > { %p1405_p5 = scmp.ge.s32.totalorder %s1876_s27, 1  ;;  %p220_p7 = scmp.lt.s32.totalorder %s1876_s27, 3 }
   0xf   : > { %p1965_p4 = por %p2335_p1, %p47_p0  ;;  %p1970_p6 = por %p213_p3, %p47_p0 }
  0x10   : > { %p1975_p8 = pnand %p1405_p5, %p220_p7  ;;  %s1878_s10 = smov [#allocation8]  }
  0x11   : > { %s2355_s30 = scalar_select %p1965_p4, 1, 0 }
  0x12   : > { %s2356_s8 = scalar_select %p1970_p6, 1, 0 }
  0x13   : > { %s2357_s9 = scalar_select %p1975_p8, 1, 0 }
  0x14   : > { %s232_s11 = sshll.u32 %s1878_s10, 4  ;;  %p1568_p9 = pneg %p1975_p8  ;;  %s1979_s11 = int_to_ptr.vmem [resolvable:$true] %s232_s11 }
  0x15   : > { %s1991_s13 = sadd.s32 1, %s1876_s27   ;;  %s34_s14 = sadd.s32 1, %s1872_s26 }
  0x16   : > { %p1986_p11 = pnand %p1568_p9, %p2335_p1  ;;  %2359 = sst [smem:[#allocation17_spill]] %s1991_s13 }
  0x17   : > { %s31_s15 = ssub.s32 %s1876_s27, %s1991_s13  ;;  %s2360_s3 = sld [smem:[#allocation20_spill]] }
  0x18   : > { %s2358_s12 = scalar_select %p1986_p11, 1, 0 }
  0x19   : > { %p2341_p13 = pneg %p1986_p11 }
  0x1d   : > { %s1656_s18 = scalar_lea.hbm %s2360_s3, 512 }
  0x1e   : > { %p1657_p12 = scmp.ne.s32.totalorder %s2360_s3, %s1656_s18  ;;  %p1663_p5 = scmp.lt.u32.totalorder %s1656_s18, %s2360_s3 }
  0x20   : > { %p1659_p0 = pnand %p2341_p13, %p1657_p12 }
  0x22   : > { %p1660_p3 = pneg %p1659_p0 }
  0x24   : > { %p1665_p7 = pnand %p1663_p5, %p1660_p3 }
  0x26   : > { %1668 = shalt.err (!%p1665_p7)
}
  0x27   : > { %s1669_s23 = scalar_lea.vmem %s1979_s11, 512  ;;  %p1677_p2 = scmp.lt.s32.totalorder %s1979_s11, %s1979_s11 }
  0x28   : > { %p1670_p9 = scmp.ne.s32.totalorder %s1979_s11, %s1669_s23  ;;  %p1678_p12 = scmp.lt.s32.totalorder %s1669_s23, %s1669_s23 }
  0x2a   : > { %p1672_p10 = pnand %p1670_p9, %p2341_p13  ;;  %p1679_p0 = por %p1678_p12, %p1677_p2 }
  0x2c   : > { %p1673_p1 = pneg %p1672_p10 }
  0x2e   : > { %p1680_p6 = pnand %p1679_p0, %p1673_p1 }
  0x30   : > { %1683 = shalt.err (!%p1680_p6)
}
  0x31   : > { %s2336_s29 = smov 128   ;;  %s2338_s10 = smov 8  }
  0x32   : > { %1571 = dma.hbm_to_vmem [thread:$0]  (!%p1986_p11), %s2360_s3, 512, %s1979_s11, [#allocation9], %s2336_s29, %s2336_s29, %s2338_s10  }
  0x33   : > { %p32_p1 = scmp.eq.s32.totalorder %s31_s15, 0  ;;  %p41_p2 = scmp.ne.s32.totalorder %s1872_s26, %s1868_s25 }
  0x34   : > { %p42_p6 = scmp.eq.s32.totalorder %s1876_s27, 0  ;;  %p1591_p10 = scmp.lt.s32.totalorder %s1876_s27, 2 }
  0x35   : > { %s2031_s18 = scalar_select %p32_p1, %s1872_s26, %s34_s14  }
  0x36   : > { %p43_p3 = por %p42_p6, %p41_p2  ;;  %p2362_p5 = scmp.eq.s32.totalorder %s1956_s28, 1 }
  0x37   : > { %2361 = sst [smem:[#allocation18_spill]] %s2031_s18  ;;  %s2337_s20 = sand.u32 1, %s1872_s26  }
  0x38   : > { %p2035_p7 = por %p2362_p5, %p41_p2  ;;  %s2041_s21 = sshll.u32 %s1876_s27, 7 }
  0x39   : > { %s2045_s22 = sshll.u32 %s2337_s20, 3  ;;  %p2047_p9 = pnand %p1591_p10, %p43_p3 }
  0x3a   : > { %s2363_s19 = scalar_select %p2035_p7, 1, 0 }
  0x3b   : > { %s2364_s11 = scalar_select %p2047_p9, 1, 0 }
  0x3c   : > { %s283_s14 = sand.u32 1, %s1876_s27   ;;  %s2365_s1 = sld [smem:[#allocation19_spill]] }
  0x3d   : > { %s287_s17 = scalar_lea.vmem [#allocation5], %s2045_s22  ;;  %s2061_s20 = scalar_lea.sflag [#allocation6], %s283_s14 }
  0x3e   : > { %s294_s29 = sshll.u32 %s287_s17, 4  ;;  %p2067_p0 = pneg %p2047_p9  ;;  %s2059_s29 = int_to_ptr.vmem [resolvable:$true] %s294_s29 }
  0x40   : > { %s2366_s3 = scalar_select %p2067_p0, 1, 0 }
  0x42   : > { %s2056_s16 = scalar_lea.hbm %s2365_s1, %s2041_s21  ;;  %s1689_s18 = scalar_lea.hbm %s2365_s1, 256 }
  0x43   : > { %s1684_s10 = scalar_lea.hbm %s2056_s16, 128  ;;  %p1690_p6 = scmp.lt.u32.totalorder %s2056_s16, %s2365_s1 }
  0x44   : > { %p1685_p12 = scmp.ne.s32.totalorder %s2056_s16, %s1684_s10  ;;  %p1691_p10 = scmp.lt.u32.totalorder %s1689_s18, %s1684_s10 }
  0x45   : > { %p1693_p5 = scmp.lt.u32.totalorder %s1684_s10, %s2056_s16 }
  0x46   : > { %p1687_p1 = pnand %p2067_p0, %p1685_p12  ;;  %p1692_p3 = por %p1691_p10, %p1690_p6 }
  0x48   : > { %p1688_p2 = pneg %p1687_p1  ;;  %p1694_p13 = por %p1693_p5, %p1692_p3 }
  0x4a   : > { %p1695_p7 = pnand %p1694_p13, %p1688_p2 }
  0x4c   : > { %1698 = shalt.err (!%p1695_p7)
}
  0x4d   : > { %s1699_s14 = scalar_lea.vmem %s2059_s29, 128  ;;  %s1881_s15 = smov [#allocation5]  }
  0x4e   : > { %p1700_p12 = scmp.ne.s32.totalorder %s2059_s29, %s1699_s14  ;;  %s1704_s23 = sshll.u32 %s1881_s15, 4  ;;  %s1705_s23 = int_to_ptr.vmem [resolvable:$false] %s1704_s23 }
  0x4f   : > { %s1706_s13 = scalar_lea.vmem %s1705_s23, 256  ;;  %p1707_p8 = scmp.lt.s32.totalorder %s2059_s29, %s1705_s23 }
  0x50   : > { %p1702_p1 = pnand %p1700_p12, %p2067_p0  ;;  %p1708_p11 = scmp.lt.s32.totalorder %s1706_s13, %s1699_s14 }
  0x52   : > { %p1703_p4 = pneg %p1702_p1  ;;  %p1709_p6 = por %p1708_p11, %p1707_p8 }
  0x54   : > { %p1710_p10 = pnand %p1709_p6, %p1703_p4 }
  0x56   : > { %1713 = shalt.err (!%p1710_p10)
}
  0x57   : > { %1581 = dma.hbm_to_vmem [thread:$0]  (!%p2047_p9), %s2056_s16, 128, %s2059_s29, %s2061_s20  }
  0x58   : > { %s1882_s10 = smov [#allocation10]   ;;  %s1714_s15 = scalar_lea.hbm %s2332_s5, 512 }
  0x59   : > { %s248_s18 = sshll.u32 %s1882_s10, 4  ;;  %p1715_p8 = scmp.ne.s32.totalorder %s2332_s5, %s1714_s15  ;;  %s249_s18 = int_to_ptr.vmem [resolvable:$true] %s248_s18 }
  0x5a   : > { %p2367_p4 = scmp.ne.s32.totalorder %s2358_s12, 0  ;;  %p1721_p2 = scmp.lt.u32.totalorder %s1714_s15, %s2332_s5 }
  0x5c   : > { %p2368_p11 = pneg %p2367_p4 }
  0x5e   : > { %p1717_p13 = pnand %p1715_p8, %p2368_p11 }
  0x60   : > { %p1718_p7 = pneg %p1717_p13 }
  0x62   : > { %p1723_p3 = pnand %p1721_p2, %p1718_p7 }
  0x64   : > { %1726 = shalt.err (!%p1723_p3)
}
  0x65   : > { %s1727_s29 = scalar_lea.vmem %s249_s18, 512  ;;  %p2369_p12 = pmov %p2368_p11 }
  0x66   : > { %p1728_p5 = scmp.ne.s32.totalorder %s249_s18, %s1727_s29  ;;  %p1735_p10 = scmp.lt.s32.totalorder %s249_s18, %s249_s18 }
  0x67   : > { %p1736_p9 = scmp.lt.s32.totalorder %s1727_s29, %s1727_s29 }
  0x68   : > { %p1730_p1 = pnand %p1728_p5, %p2369_p12 }
  0x69   : > { %p1737_p0 = por %p1736_p9, %p1735_p10 }
  0x6a   : > { %p1731_p6 = pneg %p1730_p1 }
  0x6c   : > { %p1738_p8 = pnand %p1737_p0, %p1731_p6 }
  0x6e   : > { %1741 = shalt.err (!%p1738_p8)
}
  0x6f   : > { %s2370_s1 = smov 8   ;;  %s2371_s27 = smov 128  }
  0x70   : > { %1574 = dma.hbm_to_vmem [thread:$0]  (!%p2367_p4), %s2332_s5, 512, %s249_s18, [#allocation9], %s2371_s27, %s2371_s27, %s2370_s1  }
  0x71   : > { %s2118_s23 = scalar_lea.hbm %s2327_s0, %s2041_s21  ;;  %s269_s12 = scalar_lea.vmem [#allocation2], %s2045_s22 }
  0x72   : > { %s276_s14 = sshll.u32 %s269_s12, 4  ;;  %s2372_s13 = sand.u32 1, %s1872_s26   ;;  %s277_s14 = int_to_ptr.vmem [resolvable:$true] %s276_s14 }
  0x73   : > { %s266_s29 = scalar_lea.sflag [#allocation3], %s2372_s13  ;;  %s1742_s16 = scalar_lea.hbm %s2118_s23, 128 }
  0x74   : > { %p1743_p9 = scmp.ne.s32.totalorder %s2118_s23, %s1742_s16  ;;  %p2373_p0 = scmp.ne.s32.totalorder %s2366_s3, 0 }
  0x75   : > { %s1747_s27 = scalar_lea.hbm %s2327_s0, 256  ;;  %p1748_p4 = scmp.lt.u32.totalorder %s2118_s23, %s2327_s0 }
  0x76   : > { %p1745_p11 = pnand %p1743_p9, %p2373_p0  ;;  %p1749_p7 = scmp.lt.u32.totalorder %s1747_s27, %s1742_s16 }
  0x77   : > { %p1751_p3 = scmp.lt.u32.totalorder %s1742_s16, %s2118_s23 }
  0x78   : > { %p1746_p13 = pneg %p1745_p11  ;;  %p1750_p2 = por %p1749_p7, %p1748_p4 }
  0x7a   : > { %p1752_p5 = por %p1751_p3, %p1750_p2 }
  0x7c   : > { %p1753_p12 = pnand %p1752_p5, %p1746_p13 }
  0x7e   : > { %1756 = shalt.err (!%p1753_p12)
}
  0x7f   : > { %s1757_s15 = scalar_lea.vmem %s277_s14, 128  ;;  %s1883_s12 = smov [#allocation2]  }
  0x80   : > { %p1758_p1 = scmp.ne.s32.totalorder %s277_s14, %s1757_s15  ;;  %s1762_s13 = sshll.u32 %s1883_s12, 4  ;;  %s1763_s13 = int_to_ptr.vmem [resolvable:$false] %s1762_s13 }
  0x81   : > { %s1764_s18 = scalar_lea.vmem %s1763_s13, 256  ;;  %p1765_p8 = scmp.lt.s32.totalorder %s277_s14, %s1763_s13 }
  0x82   : > { %p1760_p6 = pnand %p1758_p1, %p2373_p0  ;;  %p1766_p9 = scmp.lt.s32.totalorder %s1764_s18, %s1757_s15 }
  0x84   : > { %p1761_p10 = pneg %p1760_p6  ;;  %p1767_p11 = por %p1766_p9, %p1765_p8 }
  0x86   : > { %p1768_p4 = pnand %p1767_p11, %p1761_p10 }
  0x88   : > { %1771 = shalt.err (!%p1768_p4)
}
  0x89   : > { %p2374_p7 = scmp.ne.s32.totalorder %s2364_s11, 0  ;;  %s2144_s27 = scalar_lea.hbm %s2329_s2, %s2041_s21 }
  0x8a   : > { %s305_s10 = scalar_lea.vmem [#allocation7], %s2045_s22  ;;  %s1772_s15 = scalar_lea.hbm %s2144_s27, 128 }
  0x8b   : > { %1578 = dma.hbm_to_vmem [thread:$0]  (!%p2374_p7), %s2118_s23, 128, %s277_s14, %s266_s29  }
  0x8c   : > { %s312_s17 = sshll.u32 %s305_s10, 4  ;;  %p1773_p13 = scmp.ne.s32.totalorder %s2144_s27, %s1772_s15  ;;  %s313_s17 = int_to_ptr.vmem [resolvable:$true] %s312_s17 }
  0x8d   : > { %s1777_s23 = scalar_lea.hbm %s2329_s2, 256  ;;  %p1778_p5 = scmp.lt.u32.totalorder %s2144_s27, %s2329_s2 }
  0x8e   : > { %p1775_p2 = pnand %p1773_p13, %p2373_p0  ;;  %p1779_p12 = scmp.lt.u32.totalorder %s1777_s23, %s1772_s15 }
  0x8f   : > { %p1781_p6 = scmp.lt.u32.totalorder %s1772_s15, %s2144_s27 }
  0x90   : > { %p1776_p3 = pneg %p1775_p2  ;;  %p1780_p1 = por %p1779_p12, %p1778_p5 }
  0x92   : > { %p1782_p10 = por %p1781_p6, %p1780_p1 }
  0x94   : > { %p1783_p8 = pnand %p1782_p10, %p1776_p3 }
  0x96   : > { %1786 = shalt.err (!%p1783_p8)
}
  0x97   : > { %s1787_s21 = scalar_lea.vmem %s313_s17, 128  ;;  %s1884_s22 = smov [#allocation7]  }
  0x98   : > { %p1788_p9 = scmp.ne.s32.totalorder %s313_s17, %s1787_s21  ;;  %s1792_s18 = sshll.u32 %s1884_s22, 4  ;;  %s1793_s18 = int_to_ptr.vmem [resolvable:$false] %s1792_s18 }
  0x99   : > { %s1794_s16 = scalar_lea.vmem %s1793_s18, 256  ;;  %p1795_p13 = scmp.lt.s32.totalorder %s313_s17, %s1793_s18 }
  0x9a   : > { %p1790_p11 = pnand %p1788_p9, %p2373_p0  ;;  %p1796_p2 = scmp.lt.s32.totalorder %s1794_s16, %s1787_s21 }
  0x9c   : > { %p1791_p4 = pneg %p1790_p11  ;;  %p1797_p7 = por %p1796_p2, %p1795_p13 }
  0x9e   : > { %p1798_p5 = pnand %p1797_p7, %p1791_p4 }
  0xa0   : > { %1801 = shalt.err (!%p1798_p5)
}
  0xa1   : > { %p2375_p12 = scmp.ne.s32.totalorder %s2364_s11, 0  ;;  %p2376_p3 = scmp.ne.s32.totalorder %s2357_s9, 0 }
  0xa2   : > { %s2168_s3 = sand.u32 (!%p2376_p3), 1, %s1868_s25   ;;  %p2377_p0 = scmp.ne.s32.totalorder (!%p2376_p3), %s2355_s30, 0 }
  0xa3   : > { %1584 = dma.hbm_to_vmem [thread:$0]  (!%p2375_p12), %s2144_s27, 128, %s313_s17, %s2061_s20  }
  0xa4   : > { %321 = sbr.rel (%p2376_p3) target bundleno = 2555 (0x9fb), region = 48  ;;  %s2171_s1 = sshll.u32 (!%p2376_p3), %s2168_s3, 3 }
  0xa5   : > { %s324_s10 = scalar_lea.sflag (!%p2376_p3), [#allocation3], %s2168_s3  ;;  %s327_s15 = scalar_lea.vmem (!%p2376_p3), [#allocation2], %s2171_s1 }
  0xab   : > { %1847 = dma.done.wait (%p2377_p0), %s324_s10, 128  }
  0xac   : > { %1849 = vsyncadd (%p2377_p0), %s324_s10, 4294967168  ;;  %s332_s9 = sand.u32 1, %s1956_s28   ;;  %s336_s11 = scalar_lea.vmem [#allocation5], %s2171_s1 }
  0xad   : > { %s333_s20 = scalar_lea.sflag [#allocation6], %s332_s9 }
  0xae   : > { %1851 = dma.done.wait (%p2377_p0), %s333_s20, 256  }
  0xaf   : > { %1853 = vsyncadd (%p2377_p0), %s333_s20, 4294967040  ;;  %s345_s27 = scalar_lea.vmem [#allocation7], %s2171_s1  ;;  %p2378_p7 = scmp.eq.s32.totalorder %s1956_s28, 0 }
  0xb1   : > { %1855 = dma.done.wait (%p2378_p7), [#allocation9], 1024   ;;  %p2379_p1 = pmov %p2378_p7 }
  0xb2   : > { %v1885_v0 = vmov 0.0|0.0   ;;  %vm1886_vm0 = vmmov 0   ;;  %v1887_v1 = vmov 0.0   ;;  %v397_v2 = vld [vmem:[#allocation8] sm:$0xff]  ;;  %v398_v3 = vld [vmem:[#allocation8 + $0x8] sm:$0xff]  ;;  %v399_v4 = vld [vmem:[#allocation8 + $0x10] sm:$0xff] }
  0xb3   : > { %1857 = vsyncadd (%p2379_p1), [#allocation9], 4294966272  ;;  %1540 = vmatprep.subr.bf16.mxu0 %v1885_v0  ;;  %1480 = vmatprep.mubr.msk.f32.mxu0 %vm1886_vm0, %v1887_v1  ;;  %v1541_v5 = vpack.c.bf16 %v398_v3, %v397_v2  ;;  %v400_v6 = vld [vmem:[#allocation8 + $0x18] sm:$0xff]  ;;  %vm408_vm1 = vcmask 261120   ;;  %v395_v9 = vld [vmem:[%s336_s11] sm:$0xff]  ;;  %vm499_vm2 = vcmask 64512  }
  0xb4   : > { %1489 = vmatprep.subr.mxu1 %v1887_v1  ;;  %1491 = vmatprep.mubr.msk.f32.mxu1 %vm1886_vm0, %v1887_v1  ;;  %v1544_v7 = vpack.c.bf16 %v400_v6, %v399_v4  ;;  %v394_v8 = vld [vmem:[%s327_s15] sm:$0xff]  ;;  %s1888_s12 = smov 120   ;;  %s1889_s13 = smov 112   ;;  %vm1169_vm3 = vcmask 130048   ;;  %vm1171_vm4 = vcmask 195584  }
  0xb5   : > { %1542 = vmatpush3.bf16.msra.mxu0 %v1541_v5  ;;  %v1422_v11 = vld [vmem:[%s2331_s4] ss:$0 sm:$0xff]  ;;  %s1890_s23 = smov 104   ;;  %s1891_s14 = smov 8  }
  0xb6   : > { %1543 = vmatprep.subr.bf16.mxu0 %v1885_v0  ;;  %v396_v18 = vld [vmem:[%s345_s27] sm:$0xff]  ;;  %s1892_s29 = smov 16   ;;  %s1893_s21 = smov 24  }
  0xb7   : > { %s1441_s16 = sshll.u32 %s1956_s28, 7  ;;  %s393_s10 = scalar_lea.vmem [#allocation11], %s2171_s1 }
  0xb8   : > { %s1272_s15 = sshll.u32 %s393_s10, 4  ;;  %s2282_s11 = scalar_lea.hbm %s2334_s7, %s1441_s16  ;;  %s2284_s15 = int_to_ptr.vmem [resolvable:$true] %s1272_s15 }
  0xb9   : > { %1545 = vmatpush3.bf16.msra.mxu0 %v1544_v7  ;;  %s1259_s27 = scalar_lea.sflag [#allocation4], %s2168_s3  ;;  %s1802_s30 = scalar_lea.vmem %s2284_s15, 128 }
  0xba   : > { %1519 = vmatprep.subr.mxu0 %v1887_v1  ;;  %p1803_p6 = scmp.ne.s32.totalorder %s2284_s15, %s1802_s30  ;;  %p2380_p10 = scmp.ne.s32.totalorder %s2363_s19, 0 }
  0xbb   : > { %s1894_s28 = smov [#allocation11]  }
  0xbc   : > { %1481 = vmatmul.mubr.msk.f32.vlgmr.msra.gmra.mrb[0].mxu0 %vm408_vm1, %v394_v8  ;;  %p1804_p8 = pnand %p1803_p6, %p2380_p10  ;;  %s1806_s1 = sshll.u32 %s1894_s28, 4  ;;  %s1807_s1 = int_to_ptr.vmem [resolvable:$false] %s1806_s1 }
  0xbd   : > { %1483 = vmatprep.mubr.msk.f32.mxu0 %vm1886_vm0, %v1887_v1  ;;  %s1808_s17 = scalar_lea.vmem %s1807_s1, 256  ;;  %p1809_p11 = scmp.lt.s32.totalorder %s2284_s15, %s1807_s1 }
  0xbe   : > { %p1805_p9 = pneg %p1804_p8  ;;  %p1810_p4 = scmp.lt.s32.totalorder %s1808_s17, %s1802_s30 }
  0xc0   : > { %1484 = vmatmul.mubr.msk.f32.gmra.mrb[2].mxu0 %vm408_vm1, %v395_v9  ;;  %p1811_p13 = por %p1810_p4, %p1809_p11 }
  0xc1   : > { %1486 = vmatprep.mubr.msk.f32.mxu0 %vm1886_vm0, %v1887_v1 }
  0xc2   : > { %p1812_p2 = pnand %p1811_p13, %p1805_p9 }
  0xc4   : > { %1487 = vmatmul.mubr.msk.f32.gmra.mrb[4].mxu0 %vm408_vm1, %v396_v18  ;;  %v1174_v18 = vld [vmem:[#allocation10 + $0x8] sm:$0xff] }
  0xc5   : > { %1521 = vmatprep.mubr.msk.f32.mxu0 %vm1886_vm0, %v1887_v1 }
 0x18f   : > { %v484_v10 = vpop.f32.mrb[0].mxu0 }
 0x190   : > { %v1482_v12 = vpop.f32.mrb[1].mxu0  ;;  %v485_v13 = vadd.f32 %v1422_v11, %v484_v10 }
 0x192   : > { %v498_v17 = vmul.f32 0.35355338, %v485_v13 }
 0x193   : > { %v489_v14 = vpop.f32.mrb[2].mxu0 }
 0x194   : > { %v490_v15 = vadd.f32 %v1422_v11, %v489_v14  ;;  %v1485_v16 = vpop.f32.mrb[3].mxu0 }
 0x196   : > { %662 = vrot.lane.b32.xlu1 %v490_v15, %s1888_s12  ;;  %1490 = vmatpush3.xpose.msk.msra.mxu1 %vm499_vm2, %v490_v15 }
 0x197   : > { %1494 = vmatprep.subr.mxu1 %v1887_v1  ;;  %v494_v27 = vpop.f32.mrb[4].mxu0 }
 0x198   : > { %v2221_v28 = vadd.f32 %v1422_v11, %v494_v27  ;;  %v1488_v29 = vpop.f32.mrb[5].mxu0 }
 0x199   : > { %1492 = vmatmul.mubr.msk.f32.vlgmr.msra.gmra.mrb[0].mxu1 %vm499_vm2, %v498_v17 }
 0x19a   : > { %660 = vrot.lane.b32.xlu1 %v498_v17, %s1888_s12  ;;  %1496 = vmatprep.mubr.msk.f32.mxu1 %vm1886_vm0, %v1887_v1 }
 0x19b   : > { %1495 = vmatpush3.msra.mxu1 %v2221_v28 }
 0x19c   : > { %1499 = vmatprep.subr.mxu1 %v1887_v1 }
 0x208   : > { %v663_v32 = vpop.permute.xlu1 %662 }
 0x20c   : > { %v661_v34 = vpop.permute.xlu1 %660 }
 0x26c   : > { %v572_v19 = vpop.f32.mrb[0].mxu1 }
 0x26d   : > { %v1493_v20 = vpop.f32.mrb[1].mxu1  ;;  %v576_v21 = vsel %vm499_vm2, %v572_v19, -inf }
 0x26e   : > { %577 = vmax.xlane.f32.xlu0 %v576_v21  ;;  %v1175_v20 = vld [vmem:[#allocation10 + $0x10] sm:$0xff]  ;;  %v1176_v21 = vld [vmem:[#allocation10 + $0x18] sm:$0xff] }
 0x2fb   : > { %v578_v22 = vpop.xlane.xlu0 %577 }
 0x2fc   : > { %v579_v23 = vsub.f32 %v572_v19, %v578_v22  ;;  %v1550_v22 = vpack.c.bf16 %v1176_v21, %v1175_v20 }
 0x2fe   : > { %v580_v24 = vmul.f32 1.442695, %v579_v23 }
 0x300   : > { %1640 = vpow2.f32 %v580_v24 }
 0x30a   : > { %v1641_v25 = vpop.eup %1640 }
 0x30b   : > { %v582_v26 = vsel %vm499_vm2, %v1641_v25, 0.0 }
 0x30c   : > { %583 = vadd.xlane.f32.xlu0 %v582_v26 }
 0x399   : > { %v584_v30 = vpop.xlane.xlu0 %583 }
 0x39a   : > { %1642 = vrcp.f32 %v584_v30 }
 0x3a4   : > { %v1643_v31 = vpop.eup %1642 }
 0x3a5   : > { %v586_v33 = vmul.f32 %v1643_v31, %v1641_v25  ;;  %v1438_v31 = vld [vmem:[%s2333_s6] ss:$0 sm:$0xff] }
 0x3a7   : > { %1497 = vmatmul.mubr.msk.f32.vlgmr.msra.gmra.mrb[2].mxu1 %vm499_vm2, %v586_v33 }
 0x3a8   : > { %1500 = vmatpush3.xpose.msk.msra.mxu1 %vm499_vm2, %v663_v32  ;;  %1501 = vmatprep.mubr.msk.f32.mxu1 %vm1886_vm0, %v1887_v1 }
 0x3a9   : > { %1504 = vmatprep.subr.mxu1 %v1887_v1 }
 0x3ab   : > { %1502 = vmatmul.mubr.msk.f32.vlgmr.msra.gmra.mrb[4].mxu1 %vm499_vm2, %v661_v34 }
 0x3ac   : > { %1506 = vmatprep.mubr.msk.f32.mxu1 %vm1886_vm0, %v1887_v1 }
 0x47a   : > { %v2233_v35 = vpop.f32.mrb[2].mxu1 }
 0x47b   : > { %v1498_v36 = vpop.f32.mrb[3].mxu1 }
 0x47e   : > { %v734_v37 = vpop.f32.mrb[4].mxu1 }
 0x47f   : > { %v1503_v38 = vpop.f32.mrb[5].mxu1  ;;  %v738_v39 = vsel %vm499_vm2, %v734_v37, -inf }
 0x480   : > { %739 = vmax.xlane.f32.xlu0 %v738_v39 }
 0x496   : > { %750 = vrot.lane.b32.xlu0 %v2221_v28, %s1888_s12 }
 0x49a   : > { %828 = vrot.lane.b32.xlu0 %v490_v15, %s1889_s13 }
 0x49e   : > { %826 = vrot.lane.b32.xlu0 %v498_v17, %s1889_s13 }
 0x4a2   : > { %993 = vrot.lane.b32.xlu0 %v490_v15, %s1890_s23 }
 0x50d   : > { %v740_v40 = vpop.xlane.xlu0 %739 }
 0x50e   : > { %v741_v41 = vsub.f32 %v734_v37, %v740_v40 }
 0x510   : > { %v742_v42 = vmul.f32 1.442695, %v741_v41 }
 0x511   : > { %v751_v43 = vpop.permute.xlu0 %750 }
 0x512   : > { %1644 = vpow2.f32 %v742_v42  ;;  %1505 = vmatpush3.msra.mxu1 %v751_v43 }
 0x513   : > { %1509 = vmatprep.subr.mxu1 %v1887_v1 }
 0x515   : > { %v829_v44 = vpop.permute.xlu0 %828 }
 0x519   : > { %v827_v45 = vpop.permute.xlu0 %826 }
 0x51c   : > { %v1645_v46 = vpop.eup %1644 }
 0x51d   : > { %v994_v47 = vpop.permute.xlu0 %993  ;;  %v744_v48 = vsel %vm499_vm2, %v1645_v46, 0.0 }
 0x51e   : > { %745 = vadd.xlane.f32.xlu1 %v744_v48  ;;  %1520 = vmatpush3.xpose.msk.msra.mxu0 %vm499_vm2, %v994_v47 }
 0x51f   : > { %1546 = vmatprep.subr.bf16.mxu0 %v1885_v0 }
 0x52f   : > { %991 = vrot.lane.b32.xlu1 %v498_v17, %s1890_s23  ;;  %v1173_v17 = vld [vmem:[#allocation10] sm:$0xff] }
 0x530   : > { %v1547_v19 = vpack.c.bf16 %v1174_v18, %v1173_v17 }
 0x5ab   : > { %v746_v49 = vpop.xlane.xlu1 %745 }
 0x5ac   : > { %1646 = vrcp.f32 %v746_v49 }
 0x5af   : > { %v992_v50 = vpop.permute.xlu1 %991 }
 0x5b0   : > { %1522 = vmatmul.mubr.msk.f32.vlgmr.msra.gmra.mrb[6].mxu0 %vm499_vm2, %v992_v50 }
 0x5b1   : > { %1537 = vmatprep.mubr.msk.f32.mxu0 %vm1886_vm0, %v1887_v1  ;;  %1548 = vmatpush3.bf16.msra.mxu0 %v1547_v19 }
 0x5b2   : > { %1549 = vmatprep.subr.bf16.mxu0 %v1885_v0 }
 0x5b5   : > { %1551 = vmatpush3.bf16.msra.mxu0 %v1550_v22 }
 0x5b6   : > { %v1647_v51 = vpop.eup %1646 }
 0x5b7   : > { %v748_v52 = vmul.f32 %v1647_v51, %v1645_v46 }
 0x5b9   : > { %1507 = vmatmul.mubr.msk.f32.vlgmr.msra.gmra.mrb[6].mxu1 %vm499_vm2, %v748_v52 }
 0x5ba   : > { %1510 = vmatpush3.xpose.msk.msra.mxu1 %vm499_vm2, %v829_v44  ;;  %1511 = vmatprep.mubr.msk.f32.mxu1 %vm1886_vm0, %v1887_v1 }
 0x5bb   : > { %1514 = vmatprep.subr.mxu1 %v1887_v1 }
 0x5bd   : > { %1512 = vmatmul.mubr.msk.f32.vlgmr.msra.gmra.mrb[8].mxu1 %vm499_vm2, %v827_v45 }
 0x5be   : > { %1516 = vmatprep.mubr.msk.f32.mxu1 %vm1886_vm0, %v1887_v1 }
 0x683   : > { %v1065_v53 = vpop.f32.mrb[6].mxu0 }
 0x684   : > { %v1523_v54 = vpop.f32.mrb[7].mxu0  ;;  %v1069_v55 = vsel %vm499_vm2, %v1065_v53, -inf }
 0x685   : > { %1070 = vmax.xlane.f32.xlu1 %v1069_v55 }
 0x68c   : > { %v822_v56 = vpop.f32.mrb[6].mxu1 }
 0x68d   : > { %v1508_v57 = vpop.f32.mrb[7].mxu1 }
 0x690   : > { %v900_v58 = vpop.f32.mrb[8].mxu1 }
 0x691   : > { %v1513_v59 = vpop.f32.mrb[9].mxu1  ;;  %v904_v60 = vsel %vm499_vm2, %v900_v58, -inf }
 0x692   : > { %905 = vmax.xlane.f32.xlu0 %v904_v60 }
 0x696   : > { %1080 = vrot.lane.b32.xlu1 %v2221_v28, %s1890_s23 }
 0x712   : > { %v1071_v61 = vpop.xlane.xlu1 %1070 }
 0x713   : > { %v1072_v62 = vsub.f32 %v1065_v53, %v1071_v61 }
 0x715   : > { %v1073_v63 = vmul.f32 1.442695, %v1072_v62 }
 0x716   : > { %v1081_v15 = vpop.permute.xlu1 %1080 }
 0x717   : > { %1648 = vpow2.f32 %v1073_v63 }
 0x71f   : > { %v906_v2 = vpop.xlane.xlu0 %905 }
 0x720   : > { %v907_v3 = vsub.f32 %v900_v58, %v906_v2 }
 0x721   : > { %v1649_v4 = vpop.eup %1648 }
 0x722   : > { %v908_v5 = vmul.f32 1.442695, %v907_v3  ;;  %v1075_v6 = vsel %vm499_vm2, %v1649_v4, 0.0 }
 0x723   : > { %1076 = vadd.xlane.f32.xlu0 %v1075_v6 }
 0x724   : > { %1650 = vpow2.f32 %v908_v5 }
 0x72e   : > { %v1651_v7 = vpop.eup %1650 }
 0x72f   : > { %v910_v8 = vsel %vm499_vm2, %v1651_v7, 0.0 }
 0x730   : > { %911 = vadd.xlane.f32.xlu0 %v910_v8 }
 0x746   : > { %915 = vrot.lane.b32.xlu0 %v2221_v28, %s1889_s13 }
 0x74a   : > { %1157 = vrot.lane.b32.xlu0 %v822_v56, %s1891_s14 }
 0x7b0   : > { %v1077_v9 = vpop.xlane.xlu0 %1076 }
 0x7bd   : > { %v912_v10 = vpop.xlane.xlu0 %911 }
 0x7be   : > { %1652 = vrcp.f32 %v912_v10 }
 0x7bf   : > { %1654 = vrcp.f32 %v1077_v9 }
 0x7c1   : > { %v916_v11 = vpop.permute.xlu0 %915 }
 0x7c2   : > { %1515 = vmatpush3.msra.mxu1 %v916_v11 }
 0x7c3   : > { %1524 = vmatprep.subr.mxu1 %v1887_v1 }
 0x7c5   : > { %v1158_v26 = vpop.permute.xlu0 %1157 }
 0x7c6   : > { %v1168_v0 = vsel %vm499_vm2, %v2233_v35, %v1158_v26 }
 0x7c8   : > { %v1653_v12 = vpop.eup %1652 }
 0x7c9   : > { %v914_v13 = vmul.f32 %v1653_v12, %v1651_v7  ;;  %v1655_v14 = vpop.eup %1654 }
 0x7ca   : > { %v1079_v16 = vmul.f32 %v1655_v14, %v1649_v4 }
 0x7cb   : > { %1517 = vmatmul.mubr.msk.f32.vlgmr.msra.gmra.mrb[10].mxu1 %vm499_vm2, %v914_v13 }
 0x7cc   : > { %1525 = vmatpush3.msra.mxu1 %v1081_v15  ;;  %1526 = vmatprep.mubr.msk.f32.mxu1 %vm1886_vm0, %v1887_v1 }
 0x7cf   : > { %1527 = vmatmul.mubr.msk.f32.vlgmr.msra.gmra.mrb[12].mxu1 %vm499_vm2, %v1079_v16 }
 0x89e   : > { %v987_v23 = vpop.f32.mrb[10].mxu1 }
 0x89f   : > { %1161 = vrot.lane.b32.xlu0 %v987_v23, %s1892_s29  ;;  %v1518_v24 = vpop.f32.mrb[11].mxu1 }
 0x8a2   : > { %v1152_v1 = vpop.f32.mrb[12].mxu1 }
 0x8a3   : > { %1165 = vrot.lane.b32.xlu1 %v1152_v1, %s1893_s21  ;;  %v1528_v25 = vpop.f32.mrb[13].mxu1 }
 0x911   : > { %v1162_v27 = vpop.permute.xlu0 %1161 }
 0x912   : > { %v1170_v28 = vsel %vm1169_vm3, %v1168_v0, %v1162_v27 }
 0x915   : > { %v1166_v29 = vpop.permute.xlu1 %1165 }
 0x916   : > { %v1172_v30 = vsel %vm1171_vm4, %v1170_v28, %v1166_v29 }
 0x917   : > { %1538 = vmatmul.mubr.msk.f32.vlgmr.msra.gmra.mrb[8].mxu0 %vm408_vm1, %v1172_v30 }
 0x9ea   : > { %v1253_v32 = vpop.f32.mrb[8].mxu0 }
 0x9eb   : > { %v1254_v33 = vadd.f32 %v1438_v31, %v1253_v32  ;;  %v1539_v34 = vpop.f32.mrb[9].mxu0 }
 0x9ed   : > { %1257 = vst.msk [vmem:[%s393_s10] sm:$0xff] %vm408_vm1, %v1254_v33 }
 0x9ee   : > { %1815 = shalt.err (!%p1812_p2)
}
 0x9ef   : > { %s1816_s3 = scalar_lea.hbm %s2282_s11, 128  ;;  %s1820_s23 = scalar_lea.hbm %s2334_s7, 256 }
 0x9f0   : > { %p1817_p5 = scmp.ne.s32.totalorder %s2282_s11, %s1816_s3  ;;  %p1821_p0 = scmp.lt.u32.totalorder %s2282_s11, %s2334_s7 }
 0x9f1   : > { %p1822_p7 = scmp.lt.u32.totalorder %s1820_s23, %s1816_s3  ;;  %p1824_p6 = scmp.lt.u32.totalorder %s1816_s3, %s2282_s11 }
 0x9f2   : > { %p1818_p12 = pnand %p1817_p5, %p2380_p10 }
 0x9f3   : > { %p1823_p1 = por %p1822_p7, %p1821_p0 }
 0x9f4   : > { %p1819_p3 = pneg %p1818_p12 }
 0x9f5   : > { %p1825_p8 = por %p1824_p6, %p1823_p1 }
 0x9f7   : > { %p1826_p9 = pnand %p1825_p8, %p1819_p3 }
 0x9f9   : > { %1829 = shalt.err (!%p1826_p9)
}
 0x9fa   : > { %1566 = dma.vmem_to_hbm [thread:$0]  (%p2380_p10), %s2284_s15, 128, %s2282_s11, %s1259_s27  }
 0x9fb PF: > { %s2381_s21 = sld [smem:[#allocation16_spill]]  ;;  %s1284_s22 = sand.u32 1, %s1864_s24  }
 0x9fc   : > { %p2382_p11 = scmp.ne.s32.totalorder %s2356_s8, 0  ;;  %s1285_s18 = scalar_lea.sflag [#allocation4], %s1284_s22 }
 0xa01   : > { %p2383_p4 = scmp.ge.s32.totalorder %s2381_s21, 2 }
 0xa03   : > { %p1586_p13 = pnand %p2383_p4, %p2382_p11 }
 0xa05   : > { %1859 = dma.done.wait (!%p1586_p13), %s1285_s18, 128  }
 0xa06   : > { %1861 = vsyncadd (!%p1586_p13), %s1285_s18, 4294967168  ;;  %s2384_s27 = sld [smem:[#allocation17_spill]]  ;;  %s2385_s16 = sld [smem:[#allocation18_spill]] }
 0xa07   : > { %s2386_s24 = smov %s1868_s25  ;;  %s2387_s25 = smov %s1872_s26 }
 0xa0c   : > { %p24_p2 = scmp.ge.s32.totalorder %s2384_s27, 4   ;;  %s2388_s26 = smov %s2385_s16 }
 0xa0e   :  { %26 = sbr.rel (!%p24_p2) target bundleno = 11 (0xb), region = 125 }
 0xa15   :  { %1290 = vsyncpa [#allocation3], 1 }
 0xa16   :  { %1292 = vsyncpa [#allocation3 + $0x1], 1 }
 0xa17   :  { %1293 = vsyncpa [#allocation6], 1 }
 0xa18   :  { %1295 = vsyncpa [#allocation6 + $0x1], 1 }
 0xa19   :  { %1296 = vsyncpa [#allocation9], 1 }
 0xa1a   :  { %1297 = vsyncpa [#allocation4], 1 }
 0xa1b   :  { %1299 = vsyncpa [#allocation4 + $0x1], 1 }

</bundles_post_ra>
